<compile_context>
chip_gen: v5e
topology: v5e:2x2
jax: 0.10.0
libtpu: 0.0.40
codegen_flags: <defaults>
</compile_context>

<pallas_src>
import math

import jax
import jax.numpy as jnp
from jax import lax
from jax.experimental import pallas as pl
from jax.experimental.pallas import tpu as pltpu


def _round_up(x: int, m: int) -> int:
    return (x + m - 1) // m * m


def _cdiv(a: int, b: int) -> int:
    return -(-a // b)


def _tpu_target():
    """(num_tensorcores, vmem_cap_bytes) for the local device (conservative default)."""
    try:
        kind = jax.devices()[0].device_kind.lower()
    except Exception:
        kind = ""
    is_v7 = "v7" in kind
    num_cores = 2 if is_v7 else 1
    # v7x has 64 MiB VMEM per TensorCore -> stay <= 48 MiB there (and for
    # unknown devices).  v5e/v6e have 128 MiB -> allow larger tiles.
    if is_v7 or "tpu" not in kind:
        vmem_cap = 48 << 20
    else:
        vmem_cap = 96 << 20
    return num_cores, vmem_cap


# ----------------------------------------------------------------------------
# Pallas kernels (built per static configuration)
# ----------------------------------------------------------------------------
def _make_kernel(*, nk, tk, v_total, mask_tail, acc_in_out, compute_dtype):
    """Return (kernel_fn, uses_scratch)."""

    def _tiles(p_ref, w_ref, k):
        p = p_ref[...]
        w = w_ref[...]
        if mask_tail:
            # Last K block extends past V: the padded VMEM contents are
            # undefined and must not feed the reduction -> zero both tails.
            col = k * tk + lax.broadcasted_iota(jnp.int32, p.shape, 1)
            p = jnp.where(col < v_total, p, jnp.zeros_like(p))
            row = k * tk + lax.broadcasted_iota(jnp.int32, w.shape, 0)
            w = jnp.where(row < v_total, w, jnp.zeros_like(w))
        # In-kernel cast (VPU) right before the MXU: no extra HBM round trips.
        return p.astype(compute_dtype), w.astype(compute_dtype)

    if nk == 1:
        # Whole reduction in one tile: straight MXU matmul, no accumulator.
        def kernel(p_ref, w_ref, o_ref):
            p, w = _tiles(p_ref, w_ref, 0)
            o_ref[...] = jnp.dot(
                p, w, preferred_element_type=jnp.float32).astype(o_ref.dtype)
        return kernel, False

    if acc_in_out:
        # f32 output: accumulate directly into the resident output block.
        def kernel(p_ref, w_ref, o_ref):
            k = pl.program_id(2)

            @pl.when(k == 0)
            def _():
                o_ref[...] = jnp.zeros_like(o_ref)

            p, w = _tiles(p_ref, w_ref, k)
            o_ref[...] += jnp.dot(p, w, preferred_element_type=jnp.float32)
        return kernel, False

    # Non-f32 output: f32 VMEM scratch accumulator, cast once at the end.
    def kernel(p_ref, w_ref, o_ref, acc_ref):
        k = pl.program_id(2)

        @pl.when(k == 0)
        def _():
            acc_ref[...] = jnp.zeros_like(acc_ref)

        p, w = _tiles(p_ref, w_ref, k)
        acc_ref[...] += jnp.dot(p, w, preferred_element_type=jnp.float32)

        @pl.when(k == pl.num_programs(2) - 1)
        def _():
            o_ref[...] = acc_ref[...].astype(o_ref.dtype)
    return kernel, True


# ----------------------------------------------------------------------------
# Wrapper
# ----------------------------------------------------------------------------
def seed_embed_forward(soft_probs: jax.Array, emb: jax.Array, *,
                       tk: int | None = None,
                       compute_dtype=jnp.bfloat16,
                       out_dtype=None,
                       num_cores: int | None = None,
                       vmem_cap_bytes: int | None = None) -> jax.Array:
    """H^0 = soft_probs @ emb on the MXU (bf16 operands by default, f32 acc).

    Pass compute_dtype=jnp.float32 for a full-precision (3-pass MXU) matmul if
    downstream is sensitive to bf16 rounding of O(1/V) probabilities.
    """
    T, V = soft_probs.shape
    V2, D = emb.shape
    assert V == V2, "vocab dims must match"
    out_dtype = jnp.dtype(out_dtype or soft_probs.dtype)

    det_cores, det_cap = _tpu_target()
    if num_cores is None:
        num_cores = det_cores
    vmem_cap = int(vmem_cap_bytes or det_cap)

    p_itm = jnp.dtype(soft_probs.dtype).itemsize
    w_itm = jnp.dtype(emb.dtype).itemsize
    c_itm = jnp.dtype(compute_dtype).itemsize
    o_itm = out_dtype.itemsize
    acc_in_out = out_dtype == jnp.float32

    # ------------------------- tile selection -------------------------------
    # M / N: one full (unpadded) block each -> each operand streams from HBM
    # exactly once.  Full-dim blocks need no 8/128 alignment.
    tm, tn = T, D

    # v7x: keep >=2 blocks on a parallel axis so both TensorCores are fed.
    # Split the axis whose operand re-read is cheaper (M re-reads W, N re-reads P).
    if num_cores >= 2:
        if T >= 128 * num_cores and (T >= D or D < 128 * num_cores):
            tm = _round_up(_cdiv(T, num_cores), 128)
        elif D >= 128 * num_cores:
            tn = _round_up(_cdiv(D, num_cores), 128)

    ws_budget = int(vmem_cap * 0.75)   # leave headroom for Mosaic temporaries

    def out_block_bytes(m, n):
        return m * n * (2 * o_itm + (0 if acc_in_out else 4))

    # Shrink the resident output block if T*D alone would blow the budget
    # (rare for seed-embedder shapes).
    while out_block_bytes(tm, tn) > ws_budget // 2 and max(tm, tn) > 128:
        if tm >= tn:
            tm = max(128, _round_up(_cdiv(tm, 2), 128))
        else:
            tn = max(128, _round_up(_cdiv(tn, 2), 128))

    # K tile: as large as the remaining VMEM budget allows (double-buffered
    # native-dtype input tiles + in-kernel compute-dtype copies + mask temps).
    per_k = 2 * (tm * p_itm + tn * w_itm) + (tm + tn) * (c_itm + 4)
    tk_budget = max((ws_budget - out_block_bytes(tm, tn)) // per_k, 128)

    if tk is None:
        if V <= tk_budget:
            tk = V                        # whole vocab in one tile (full-dim block)
        else:
            pref = 2048 if num_cores >= 2 else 4096
            tk = max(128, (min(pref, tk_budget) // 128) * 128)
    else:
        tk = V if tk >= V else max(128, (tk // 128) * 128)

    nk = _cdiv(V, tk)
    if nk == 1:
        tk = V
    mask_tail = (V % tk) != 0

    nm, nn = _cdiv(T, tm), _cdiv(D, tn)

    kernel, use_scratch = _make_kernel(
        nk=nk, tk=tk, v_total=V, mask_tail=mask_tail,
        acc_in_out=acc_in_out, compute_dtype=compute_dtype)

    if nk == 1:
        grid = (nm, nn)
        in_specs = [pl.BlockSpec((tm, tk), lambda i, j: (i, 0)),
                    pl.BlockSpec((tk, tn), lambda i, j: (0, j))]
        out_specs = pl.BlockSpec((tm, tn), lambda i, j: (i, j))
        semantics = ("parallel", "parallel")
    else:
        # NOTE: default double-buffering; pl.Buffered(3) on the K-varying specs
        # is a possible few-% tweak but not needed for correctness.
        grid = (nm, nn, nk)
        in_specs = [pl.BlockSpec((tm, tk), lambda i, j, k: (i, k)),
                    pl.BlockSpec((tk, tn), lambda i, j, k: (k, j))]
        out_specs = pl.BlockSpec((tm, tn), lambda i, j, k: (i, j))
        semantics = ("parallel", "parallel", "arbitrary")

    scratch_shapes = [pltpu.VMEM((tm, tn), jnp.float32)] if use_scratch else []

    grid_spec = pltpu.PrefetchScalarGridSpec(
        num_scalar_prefetch=0, grid=grid,
        in_specs=in_specs, out_specs=out_specs,
        scratch_shapes=scratch_shapes)

    # Scheduler hint (counts operand re-reads caused by M/N splits).
    cost = pl.CostEstimate(
        flops=2 * T * V * D,
        transcendentals=0,
        bytes_accessed=T * V * p_itm * nn + V * D * w_itm * nm + T * D * o_itm)

    vmem_needed = (2 * (tm * tk * p_itm + tk * tn * w_itm)   # dbl-buffered inputs
                   + 2 * tm * tn * o_itm                      # output block
                   + (0 if (acc_in_out or nk == 1) else tm * tn * 4)  # scratch acc
                   + (tm * tk + tk * tn) * c_itm              # in-kernel casts
                   + ((tm * tk + tk * tn) * 4 if mask_tail else 0))   # mask temps
    vmem_limit = int(min(vmem_cap, max(int(vmem_needed * 1.2) + (2 << 20), 16 << 20)))

    return pl.pallas_call(
        kernel,
        out_shape=jax.ShapeDtypeStruct((T, D), out_dtype),
        grid_spec=grid_spec,
        compiler_params=pltpu.CompilerParams(
            dimension_semantics=semantics,
            vmem_limit_bytes=vmem_limit),
        cost_estimate=cost,
    )(soft_probs, emb)


# ----------------------------------------------------------------------------
# Deterministic vocabulary-aware Xavier init (mirrors SeedEmbedder.__init__).
# Parameter construction, not a kernel: done host-side in plain JAX.
# ----------------------------------------------------------------------------
def build_embedding_matrix(key, piece_lengths, piece_probs, embed_dim):
    vocab_size = len(piece_lengths)
    xavier_base_variance = 2.0 / (embed_dim + vocab_size)

    lengths = jnp.asarray(piece_lengths)                      # [V]
    probs = jnp.asarray(piece_probs, dtype=jnp.float32)       # [V]

    std_single = math.sqrt(xavier_base_variance)
    std_multi = jnp.sqrt(xavier_base_variance / jnp.sqrt(probs))
    row_std = jnp.where(lengths == 1, std_single, std_multi)  # [V]

    noise = jax.random.normal(key, (vocab_size, embed_dim), dtype=jnp.float32)
    return noise * row_std[:, None]                           # [V, d]


if __name__ == "__main__":
    key = jax.random.PRNGKey(0)
    k_emb, k_probs, k_len, k_p = jax.random.split(key, 4)

    def make_inputs(T, V, D):
        piece_lengths = jax.random.randint(k_len, (V,), 1, 5)
        piece_probs = jax.nn.softmax(jax.random.normal(k_probs, (V,)))
        emb = build_embedding_matrix(k_emb, piece_lengths, piece_probs, D)  # [V, D]
        soft_probs = jax.nn.softmax(jax.random.normal(k_p, (T, V)), axis=-1)
        return soft_probs, emb

    def check(T, V, D, **kw):
        soft_probs, emb = make_inputs(T, V, D)
        h0 = jax.block_until_ready(seed_embed_forward(soft_probs, emb, **kw))
        ref = soft_probs @ emb
        assert h0.shape == (T, D), (h0.shape, (T, D))
        # bf16 operands -> loosened tolerance vs the f32 reference.
        assert jnp.allclose(h0.astype(jnp.float32), ref, atol=3e-2, rtol=3e-2), (T, V, D, kw)

    # 1) Small MXU-aligned shape, single-K fast path (whole vocab in one tile).
    check(128, 256, 128)
    # 2) K-tiled accumulation directly into the resident f32 output block.
    check(128, 1024, 128, tk=256)
    # 3) Non-aligned real-world-ish shape: full-dim blocks, no padding copies.
    check(100, 300, 96)
    # 4) Non-aligned vocab with K tiling: exercises the in-kernel tail mask.
    check(100, 300, 96, tk=128)
    # 5) Forced 2-TensorCore split of the parallel M axis (v7x-style grid).
    check(256, 512, 192, num_cores=2)
    # 6) bf16 output: exercises the f32 scratch-accumulator path.
    check(128, 384, 128, tk=128, out_dtype=jnp.bfloat16)

    print("KERNEL_OK")
</pallas_src>

<mosaic_0001>
module attributes {stable_mosaic.version = 11 : i64} {
  func.func @kernel(%arg0: i32, %arg1: i32, %arg2: memref<128x256xf32, #tpu.memory_space<vmem>>, %arg3: memref<256x128xf32, #tpu.memory_space<vmem>>, %arg4: memref<128x128xf32, #tpu.memory_space<vmem>>) attributes {dimension_semantics = [#tpu.dimension_semantics<parallel>, #tpu.dimension_semantics<parallel>], iteration_bounds = array<i64: 1, 1>, scalar_prefetch = 0 : i64, scratch_operands = 0 : i64, tpu.core_type = #tpu.core_type<tc>, window_params = [{transform_indices = @transform_0, window_bounds = array<i64: 128, 256>}, {transform_indices = @transform_1, window_bounds = array<i64: 256, 128>}, {transform_indices = @transform_2, window_bounds = array<i64: 128, 128>}]} {
    %c0 = arith.constant 0 : index
    %c0_0 = arith.constant 0 : index
    %0 = vector.load %arg2[%c0, %c0_0] : memref<128x256xf32, #tpu.memory_space<vmem>>, vector<128x256xf32>
    %c0_1 = arith.constant 0 : index
    %c0_2 = arith.constant 0 : index
    %1 = vector.load %arg3[%c0_1, %c0_2] : memref<256x128xf32, #tpu.memory_space<vmem>>, vector<256x128xf32>
    %2 = arith.truncf %0 : vector<128x256xf32> to vector<128x256xbf16>
    %3 = arith.truncf %1 : vector<256x128xf32> to vector<256x128xbf16>
    %cst = arith.constant dense<0.000000e+00> : vector<128x128xf32>
    %4 = tpu.matmul %2, %3, %cst {dimension_numbers = #tpu.dot_dimension_numbers<[1], [0], [0], [1], [0, 0, 1, 1], [], []>} : vector<128x256xbf16>, vector<256x128xbf16>, vector<128x128xf32> -> vector<128x128xf32>
    %c0_3 = arith.constant 0 : index
    %c0_4 = arith.constant 0 : index
    %5 = vector.load %arg4[%c0_3, %c0_4] : memref<128x128xf32, #tpu.memory_space<vmem>>, vector<128x128xf32>
    tpu.vector_store %arg4[%c0_3, %c0_4], %4 {strides = array<i32>} : memref<128x128xf32, #tpu.memory_space<vmem>>, vector<128x128xf32>,
    return
  }
  func.func @transform_0(%arg0: i32, %arg1: i32) -> (i32, i32) {
    %c0_i32 = arith.constant 0 : i32
    %c0_i32_0 = arith.constant 0 : i32
    return %arg0, %c0_i32 : i32, i32
  }
  func.func @transform_1(%arg0: i32, %arg1: i32) -> (i32, i32) {
    %c0_i32 = arith.constant 0 : i32
    %c0_i32_0 = arith.constant 0 : i32
    return %c0_i32, %arg1 : i32, i32
  }
  func.func @transform_2(%arg0: i32, %arg1: i32) -> (i32, i32) {
    %c0_i32 = arith.constant 0 : i32
    return %arg0, %arg1 : i32, i32
  }
}

</mosaic_0001>

<bundles_post_ra>
// kernel: tpu_custom_call.1
= control target key start
LH: loop header
LB: loop body
LE: loop exit
PB: predicated region body
PF: predicated region fallthrough
CT: control target
= control target key end

     0   :  { %7 = vsyncpa [#allocation3], 0  ;;  %s412_s0 = inlined_call_operand.hbm [shape: f32[128,256], index: 0, kind: input, shape index: {}]   ;;  %s413_s1 = inlined_call_operand.hbm [shape: f32[256,128], index: 1, kind: input, shape index: {}]   ;;  %s414_s2 = inlined_call_operand.hbm [shape: f32[128,128], index: 2, kind: output, shape index: {}]  }
   0x1   :  { %8 = vsyncpa [#allocation6], 0 }
   0x2   :  { %9 = vsyncpa [#allocation4], 0  ;;  %s14_s11 = sshll.u32 %s412_s0, 4  ;;  %s375_s12 = smov [#allocation2]   ;;  %s15_s11 = int_to_ptr.hbm [resolvable:$true] %s14_s11 }
   0x3   :  { %s16_s13 = sshll.u32 %s375_s12, 4  ;;  %s27_s16 = sshll.u32 %s413_s1, 4  ;;  %s17_s13 = int_to_ptr.vmem [resolvable:$true] %s16_s13  ;;  %s28_s16 = int_to_ptr.hbm [resolvable:$true] %s27_s16 }
   0x4   :  { %s376_s17 = smov 256   ;;  %s377_s18 = smov 16  }
   0x5   :  { %22 = dma.hbm_to_vmem [thread:$0]  %s15_s11, 4096, %s17_s13, [#allocation3], %s376_s17, %s376_s17, %s377_s18  }
   0x6   :  { %s378_s19 = smov [#allocation5]   ;;  %s379_s21 = smov 128  }
   0x7   :  { %s29_s20 = sshll.u32 %s378_s19, 4  ;;  %s380_s22 = smov 8   ;;  %s30_s20 = int_to_ptr.vmem [resolvable:$true] %s29_s20 }
   0x8   :  { %35 = dma.hbm_to_vmem [thread:$0]  %s28_s16, 4096, %s30_s20, [#allocation6], %s379_s21, %s379_s21, %s380_s22  }
   0x9   :  { %369 = dma.done.wait [#allocation3], 4096  }
   0xa   :  { %370 = vsyncadd [#allocation3], 4294963200 }
   0xb   :  { %371 = dma.done.wait [#allocation6], 4096  }
   0xc   :  { %372 = vsyncadd [#allocation6], 4294963200  ;;  %v90_v0 = vld [vmem:[#allocation5 + $0x70] sm:$0xff]  ;;  %v91_v1 = vld [vmem:[#allocation5 + $0x78] sm:$0xff]  ;;  %s381_s0 = smov [#allocation7]   ;;  %s260_s25 = sshll.u32 %s414_s2, 4  ;;  %s261_s25 = int_to_ptr.hbm [resolvable:$true] %s260_s25 }
   0xd   :  { %v106_v2 = vld [vmem:[#allocation5 + $0xf0] sm:$0xff]  ;;  %v131_v3 = vpack.c.bf16 %v91_v1, %v90_v0  ;;  %v107_v4 = vld [vmem:[#allocation5 + $0xf8] sm:$0xff]  ;;  %v88_v5 = vld [vmem:[#allocation5 + $0x60] sm:$0xff]  ;;  %s258_s1 = sshll.u32 %s381_s0, 4  ;;  %s259_s1 = int_to_ptr.vmem [resolvable:$true] %s258_s1 }
   0xe   :  { %v89_v6 = vld [vmem:[#allocation5 + $0x68] sm:$0xff]  ;;  %v139_v7 = vpack.c.bf16 %v107_v4, %v106_v2  ;;  %v104_v8 = vld [vmem:[#allocation5 + $0xe0] sm:$0xff]  ;;  %v86_v12 = vld [vmem:[#allocation5 + $0x50] sm:$0xff] }
   0xf   :  { %v105_v9 = vld [vmem:[#allocation5 + $0xe8] sm:$0xff]  ;;  %140 = vmatpush.bf16.msra.mxu0 %v131_v3  ;;  %274 = vmatpush.bf16.msra.mxu2 %v131_v3  ;;  %v130_v10 = vpack.c.bf16 %v89_v6, %v88_v5  ;;  %v87_v13 = vld [vmem:[#allocation5 + $0x58] sm:$0xff]  ;;  %v102_v14 = vld [vmem:[#allocation5 + $0xd0] sm:$0xff] }
  0x10   :  { %189 = vmatpush.bf16.msra.mxu1 %v139_v7  ;;  %282 = vmatpush.bf16.msra.mxu3 %v139_v7  ;;  %v138_v11 = vpack.c.bf16 %v105_v9, %v104_v8  ;;  %v103_v15 = vld [vmem:[#allocation5 + $0xd8] sm:$0xff]  ;;  %v129_v16 = vpack.c.bf16 %v87_v13, %v86_v12  ;;  %v84_v18 = vld [vmem:[#allocation5 + $0x40] sm:$0xff]  ;;  %v85_v19 = vld [vmem:[#allocation5 + $0x48] sm:$0xff] }
  0x11   :  { %v137_v17 = vpack.c.bf16 %v103_v15, %v102_v14  ;;  %v100_v20 = vld [vmem:[#allocation5 + $0xc0] sm:$0xff]  ;;  %v101_v21 = vld [vmem:[#allocation5 + $0xc8] sm:$0xff]  ;;  %v128_v22 = vpack.c.bf16 %v85_v19, %v84_v18  ;;  %v82_v24 = vld [vmem:[#allocation5 + $0x30] sm:$0xff] }
  0x12   :  { %v136_v23 = vpack.c.bf16 %v101_v21, %v100_v20  ;;  %v83_v25 = vld [vmem:[#allocation5 + $0x38] sm:$0xff]  ;;  %v98_v26 = vld [vmem:[#allocation5 + $0xb0] sm:$0xff]  ;;  %v80_v30 = vld [vmem:[#allocation5 + $0x20] sm:$0xff] }
  0x13   :  { %141 = vmatpush.bf16.msra.mxu0 %v130_v10  ;;  %275 = vmatpush.bf16.msra.mxu2 %v130_v10  ;;  %v99_v27 = vld [vmem:[#allocation5 + $0xb8] sm:$0xff]  ;;  %v127_v28 = vpack.c.bf16 %v83_v25, %v82_v24  ;;  %v81_v31 = vld [vmem:[#allocation5 + $0x28] sm:$0xff]  ;;  %v96_v32 = vld [vmem:[#allocation5 + $0xa0] sm:$0xff] }
  0x14   :  { %190 = vmatpush.bf16.msra.mxu1 %v138_v11  ;;  %283 = vmatpush.bf16.msra.mxu3 %v138_v11  ;;  %v135_v29 = vpack.c.bf16 %v99_v27, %v98_v26  ;;  %v97_v33 = vld [vmem:[#allocation5 + $0xa8] sm:$0xff]  ;;  %v126_v34 = vpack.c.bf16 %v81_v31, %v80_v30  ;;  %v78_v36 = vld [vmem:[#allocation5 + $0x10] sm:$0xff]  ;;  %v79_v37 = vld [vmem:[#allocation5 + $0x18] sm:$0xff] }
  0x15   :  { %v134_v35 = vpack.c.bf16 %v97_v33, %v96_v32  ;;  %v94_v38 = vld [vmem:[#allocation5 + $0x90] sm:$0xff]  ;;  %v95_v39 = vld [vmem:[#allocation5 + $0x98] sm:$0xff]  ;;  %v125_v40 = vpack.c.bf16 %v79_v37, %v78_v36  ;;  %v76_v42 = vld [vmem:[#allocation5] sm:$0xff] }
  0x16   :  { %v133_v41 = vpack.c.bf16 %v95_v39, %v94_v38  ;;  %v77_v43 = vld [vmem:[#allocation5 + $0x8] sm:$0xff]  ;;  %v92_v44 = vld [vmem:[#allocation5 + $0x80] sm:$0xff]  ;;  %v46_v47 = vld [vmem:[#allocation2 + $0x10] sm:$0xff] }
  0x17   :  { %142 = vmatpush.bf16.msra.mxu0 %v129_v16  ;;  %276 = vmatpush.bf16.msra.mxu2 %v129_v16  ;;  %v93_v45 = vld [vmem:[#allocation5 + $0x88] sm:$0xff]  ;;  %v44_v46 = vld [vmem:[#allocation2] sm:$0xff]  ;;  %v124_v48 = vpack.c.bf16 %v77_v43, %v76_v42  ;;  %v62_v50 = vld [vmem:[#allocation2 + $0x90] sm:$0xff] }
  0x18   :  { %191 = vmatpush.bf16.msra.mxu1 %v137_v17  ;;  %284 = vmatpush.bf16.msra.mxu3 %v137_v17  ;;  %v60_v49 = vld [vmem:[#allocation2 + $0x80] sm:$0xff]  ;;  %v45_v51 = vld [vmem:[#allocation2 + $0x8] sm:$0xff]  ;;  %v132_v52 = vpack.c.bf16 %v93_v45, %v92_v44  ;;  %v47_v53 = vld [vmem:[#allocation2 + $0x18] sm:$0xff]  ;;  %v108_v56 = vpack.c.bf16 %v46_v47, %v44_v46 }
  0x19   :  { %v61_v54 = vld [vmem:[#allocation2 + $0x88] sm:$0xff]  ;;  %v63_v55 = vld [vmem:[#allocation2 + $0x98] sm:$0xff]  ;;  %v116_v57 = vpack.c.bf16 %v62_v50, %v60_v49  ;;  %v109_v58 = vpack.c.bf16 %v47_v53, %v45_v51  ;;  %v48_v60 = vld [vmem:[#allocation2 + $0x20] sm:$0xff] }
  0x1a   :  { %v117_v59 = vpack.c.bf16 %v63_v55, %v61_v54  ;;  %v50_v61 = vld [vmem:[#allocation2 + $0x30] sm:$0xff]  ;;  %v64_v62 = vld [vmem:[#allocation2 + $0xa0] sm:$0xff]  ;;  %v49_v0 = vld [vmem:[#allocation2 + $0x28] sm:$0xff] }
  0x1b   :  { %143 = vmatpush.bf16.msra.mxu0 %v128_v22  ;;  %277 = vmatpush.bf16.msra.mxu2 %v128_v22  ;;  %v66_v63 = vld [vmem:[#allocation2 + $0xb0] sm:$0xff]  ;;  %v51_v1 = vld [vmem:[#allocation2 + $0x38] sm:$0xff]  ;;  %v65_v2 = vld [vmem:[#allocation2 + $0xa8] sm:$0xff]  ;;  %v110_v4 = vpack.c.bf16 %v50_v61, %v48_v60 }
  0x1c   :  { %192 = vmatpush.bf16.msra.mxu1 %v136_v23  ;;  %285 = vmatpush.bf16.msra.mxu3 %v136_v23  ;;  %v67_v3 = vld [vmem:[#allocation2 + $0xb8] sm:$0xff]  ;;  %v118_v5 = vpack.c.bf16 %v66_v63, %v64_v62  ;;  %v111_v6 = vpack.c.bf16 %v51_v1, %v49_v0  ;;  %v52_v8 = vld [vmem:[#allocation2 + $0x40] sm:$0xff]  ;;  %v54_v9 = vld [vmem:[#allocation2 + $0x50] sm:$0xff] }
  0x1d   :  { %v119_v7 = vpack.c.bf16 %v67_v3, %v65_v2  ;;  %v68_v10 = vld [vmem:[#allocation2 + $0xc0] sm:$0xff]  ;;  %v70_v11 = vld [vmem:[#allocation2 + $0xd0] sm:$0xff]  ;;  %v53_v12 = vld [vmem:[#allocation2 + $0x48] sm:$0xff]  ;;  %v112_v16 = vpack.c.bf16 %v54_v9, %v52_v8 }
  0x1e   :  { %v55_v13 = vld [vmem:[#allocation2 + $0x58] sm:$0xff]  ;;  %v69_v14 = vld [vmem:[#allocation2 + $0xc8] sm:$0xff]  ;;  %v120_v17 = vpack.c.bf16 %v70_v11, %v68_v10  ;;  %v56_v20 = vld [vmem:[#allocation2 + $0x60] sm:$0xff] }
  0x1f   :  { %144 = vmatpush.bf16.msra.mxu0 %v127_v28  ;;  %278 = vmatpush.bf16.msra.mxu2 %v127_v28  ;;  %v71_v15 = vld [vmem:[#allocation2 + $0xd8] sm:$0xff]  ;;  %v113_v18 = vpack.c.bf16 %v55_v13, %v53_v12  ;;  %v58_v21 = vld [vmem:[#allocation2 + $0x70] sm:$0xff]  ;;  %v72_v22 = vld [vmem:[#allocation2 + $0xe0] sm:$0xff] }
  0x20   :  { %193 = vmatpush.bf16.msra.mxu1 %v135_v29  ;;  %286 = vmatpush.bf16.msra.mxu3 %v135_v29  ;;  %v121_v19 = vpack.c.bf16 %v71_v15, %v69_v14  ;;  %v74_v23 = vld [vmem:[#allocation2 + $0xf0] sm:$0xff]  ;;  %v57_v24 = vld [vmem:[#allocation2 + $0x68] sm:$0xff]  ;;  %v59_v25 = vld [vmem:[#allocation2 + $0x78] sm:$0xff]  ;;  %v114_v28 = vpack.c.bf16 %v58_v21, %v56_v20 }
  0x21   :  { %v73_v26 = vld [vmem:[#allocation2 + $0xe8] sm:$0xff]  ;;  %v75_v27 = vld [vmem:[#allocation2 + $0xf8] sm:$0xff]  ;;  %v122_v29 = vpack.c.bf16 %v74_v23, %v72_v22  ;;  %v115_v30 = vpack.c.bf16 %v59_v25, %v57_v24 }
  0x22   :  { %v123_v31 = vpack.c.bf16 %v75_v27, %v73_v26 }
  0x23   :  { %145 = vmatpush.bf16.msra.mxu0 %v126_v34  ;;  %279 = vmatpush.bf16.msra.mxu2 %v126_v34 }
  0x24   :  { %194 = vmatpush.bf16.msra.mxu1 %v134_v35  ;;  %287 = vmatpush.bf16.msra.mxu3 %v134_v35 }
  0x27   :  { %146 = vmatpush.bf16.msra.mxu0 %v125_v40  ;;  %280 = vmatpush.bf16.msra.mxu2 %v125_v40 }
  0x28   :  { %195 = vmatpush.bf16.msra.mxu1 %v133_v41  ;;  %288 = vmatpush.bf16.msra.mxu3 %v133_v41 }
  0x2b   :  { %147 = vmatpush.bf16.msra.mxu0 %v124_v48  ;;  %281 = vmatpush.bf16.msra.mxu2 %v124_v48 }
  0x2c   :  { %196 = vmatpush.bf16.msra.mxu1 %v132_v52  ;;  %289 = vmatpush.bf16.msra.mxu3 %v132_v52 }
  0x2e   :  { %148 = vmatmul.bf16.vlgmr.msra.gmra.mxu0 %v108_v56  ;;  %168 = vmatmul.bf16.vlgmr.msra.gmra.mxu2 %v116_v57 }
  0x2f   :  { %197 = vmatmul.bf16.vlgmr.msra.gmra.mxu1 %v109_v58  ;;  %217 = vmatmul.bf16.vlgmr.msra.gmra.mxu3 %v117_v59 }
  0x3e   :  { %153 = vmatmul.bf16.gmra.mxu0 %v110_v4  ;;  %173 = vmatmul.bf16.gmra.mxu2 %v118_v5 }
  0x3f   :  { %202 = vmatmul.bf16.gmra.mxu1 %v111_v6  ;;  %222 = vmatmul.bf16.gmra.mxu3 %v119_v7 }
  0x4e   :  { %158 = vmatmul.bf16.gmra.mxu0 %v112_v16  ;;  %178 = vmatmul.bf16.gmra.mxu2 %v120_v17 }
  0x4f   :  { %207 = vmatmul.bf16.gmra.mxu1 %v113_v18  ;;  %227 = vmatmul.bf16.gmra.mxu3 %v121_v19 }
  0x5e   :  { %163 = vmatmul.bf16.gmra.mxu0 %v114_v28  ;;  %183 = vmatmul.bf16.gmra.mxu2 %v122_v29 }
  0x5f   :  { %212 = vmatmul.bf16.gmra.mxu1 %v115_v30  ;;  %232 = vmatmul.bf16.gmra.mxu3 %v123_v31 }
  0xab   :  { %v149_v32 = vpop.f32.mrf.mxu0 }
  0xac   :  { %v198_v33 = vpop.f32.mrf.mxu1 }
  0xad   :  { %v199_v34 = vadd.f32 %v198_v33, %v149_v32 }
  0xaf   :  { %238 = vst [vmem:[#allocation7] sm:$0xff] %v199_v34 }
  0xb1   :  { %v169_v35 = vpop.f32.mrf.mxu2 }
  0xb2   :  { %v218_v36 = vpop.f32.mrf.mxu3 }
  0xb3   :  { %v219_v37 = vadd.f32 %v218_v36, %v169_v35  ;;  %v151_v38 = vpop.f32.mrf.mxu0 }
  0xb4   :  { %v200_v39 = vpop.f32.mrf.mxu1 }
  0xb5   :  { %246 = vst [vmem:[#allocation7 + $0x40] sm:$0xff] %v219_v37  ;;  %v201_v40 = vadd.f32 %v200_v39, %v151_v38 }
  0xb7   :  { %239 = vst [vmem:[#allocation7 + $0x8] sm:$0xff] %v201_v40 }
  0xb9   :  { %v171_v41 = vpop.f32.mrf.mxu2 }
  0xba   :  { %v220_v42 = vpop.f32.mrf.mxu3 }
  0xbb   :  { %v221_v43 = vadd.f32 %v220_v42, %v171_v41  ;;  %v154_v44 = vpop.f32.mrf.mxu0 }
  0xbc   :  { %v203_v45 = vpop.f32.mrf.mxu1 }
  0xbd   :  { %247 = vst [vmem:[#allocation7 + $0x48] sm:$0xff] %v221_v43  ;;  %v204_v46 = vadd.f32 %v203_v45, %v154_v44 }
  0xbf   :  { %240 = vst [vmem:[#allocation7 + $0x10] sm:$0xff] %v204_v46 }
  0xc1   :  { %v174_v47 = vpop.f32.mrf.mxu2 }
  0xc2   :  { %v223_v48 = vpop.f32.mrf.mxu3 }
  0xc3   :  { %v224_v49 = vadd.f32 %v223_v48, %v174_v47  ;;  %v156_v50 = vpop.f32.mrf.mxu0 }
  0xc4   :  { %v205_v51 = vpop.f32.mrf.mxu1 }
  0xc5   :  { %248 = vst [vmem:[#allocation7 + $0x50] sm:$0xff] %v224_v49  ;;  %v206_v52 = vadd.f32 %v205_v51, %v156_v50 }
  0xc7   :  { %241 = vst [vmem:[#allocation7 + $0x18] sm:$0xff] %v206_v52 }
  0xc9   :  { %v176_v53 = vpop.f32.mrf.mxu2 }
  0xca   :  { %v225_v54 = vpop.f32.mrf.mxu3 }
  0xcb   :  { %v226_v55 = vadd.f32 %v225_v54, %v176_v53  ;;  %v159_v56 = vpop.f32.mrf.mxu0 }
  0xcc   :  { %v208_v57 = vpop.f32.mrf.mxu1 }
  0xcd   :  { %249 = vst [vmem:[#allocation7 + $0x58] sm:$0xff] %v226_v55  ;;  %v209_v58 = vadd.f32 %v208_v57, %v159_v56 }
  0xcf   :  { %242 = vst [vmem:[#allocation7 + $0x20] sm:$0xff] %v209_v58 }
  0xd1   :  { %v179_v59 = vpop.f32.mrf.mxu2 }
  0xd2   :  { %v228_v60 = vpop.f32.mrf.mxu3 }
  0xd3   :  { %v229_v61 = vadd.f32 %v228_v60, %v179_v59  ;;  %v161_v62 = vpop.f32.mrf.mxu0 }
  0xd4   :  { %v210_v63 = vpop.f32.mrf.mxu1 }
  0xd5   :  { %250 = vst [vmem:[#allocation7 + $0x60] sm:$0xff] %v229_v61  ;;  %v211_v0 = vadd.f32 %v210_v63, %v161_v62 }
  0xd7   :  { %243 = vst [vmem:[#allocation7 + $0x28] sm:$0xff] %v211_v0 }
  0xd9   :  { %v181_v1 = vpop.f32.mrf.mxu2 }
  0xda   :  { %v230_v2 = vpop.f32.mrf.mxu3 }
  0xdb   :  { %v231_v3 = vadd.f32 %v230_v2, %v181_v1  ;;  %v164_v4 = vpop.f32.mrf.mxu0 }
  0xdc   :  { %v213_v5 = vpop.f32.mrf.mxu1 }
  0xdd   :  { %251 = vst [vmem:[#allocation7 + $0x68] sm:$0xff] %v231_v3  ;;  %v214_v6 = vadd.f32 %v213_v5, %v164_v4 }
  0xdf   :  { %244 = vst [vmem:[#allocation7 + $0x30] sm:$0xff] %v214_v6 }
  0xe1   :  { %v184_v7 = vpop.f32.mrf.mxu2 }
  0xe2   :  { %v233_v8 = vpop.f32.mrf.mxu3 }
  0xe3   :  { %v234_v9 = vadd.f32 %v233_v8, %v184_v7  ;;  %v166_v10 = vpop.f32.mrf.mxu0 }
  0xe4   :  { %v215_v11 = vpop.f32.mrf.mxu1 }
  0xe5   :  { %252 = vst [vmem:[#allocation7 + $0x70] sm:$0xff] %v234_v9  ;;  %v216_v12 = vadd.f32 %v215_v11, %v166_v10 }
  0xe7   :  { %245 = vst [vmem:[#allocation7 + $0x38] sm:$0xff] %v216_v12 }
  0xe9   :  { %v186_v13 = vpop.f32.mrf.mxu2 }
  0xea   :  { %v235_v14 = vpop.f32.mrf.mxu3 }
  0xeb   :  { %v236_v15 = vadd.f32 %v235_v14, %v186_v13 }
  0xed   :  { %253 = vst [vmem:[#allocation7 + $0x78] sm:$0xff] %v236_v15 }
  0xee   :  { %266 = dma.vmem_to_hbm [thread:$0]  %s259_s1, 2048, %s261_s25, [#allocation4], %s379_s21, %s379_s21, %s380_s22  }
  0xef   :  { %373 = dma.done.wait [#allocation4], 2048  }
  0xf0   :  { %374 = vsyncadd [#allocation4], 4294965248 }
  0xf1   :  { %271 = vsyncpa [#allocation3], 1 }
  0xf2   :  { %272 = vsyncpa [#allocation6], 1 }
  0xf3   :  { %273 = vsyncpa [#allocation4], 1 }

</bundles_post_ra>
